<compile_context>
chip_gen: v5e
topology: v5e:2x2
jax: 0.10.0
libtpu: 0.0.40
codegen_flags: <defaults>
</compile_context>

<pallas_src>
import functools

import jax
import jax.numpy as jnp
from jax.experimental import pallas as pl
from jax.experimental.pallas import tpu as pltpu

HIDDEN = 64
LANE = 128


def _round_up(n, m):
    return ((n + m - 1) // m) * m


def _mlp_kernel(x_ref, w1_ref, b1_ref, w2_ref, b2_ref, o_ref):
    # x_ref:  (tb, F) f32     w1_ref: (F, Hp) f32    b1_ref: (1, Hp) f32
    # w2_ref: (Hp, C) f32     b2_ref: (1, C)  f32    o_ref:  (tb, C) f32
    x = x_ref[...]
    h = jnp.dot(x, w1_ref[...], preferred_element_type=jnp.float32) + b1_ref[...]
    h = jnp.maximum(h, 0.0)  # ReLU
    logits = (
        jnp.dot(h, w2_ref[...], preferred_element_type=jnp.float32) + b2_ref[...]
    )
    o_ref[...] = logits.astype(o_ref.dtype)


def prepare_params(w1, b1, w2, b2):
    """One-time parameter prep (run once, reuse across forward calls).

    Pads the hidden dim to 128 lanes (zero rows/cols) so the intermediate
    activation is lane-dense for both matmuls; the class dim is NOT padded so
    the kernel writes only the real logits back to HBM.
    """
    F, H = w1.shape
    C = w2.shape[-1]
    Hp = _round_up(max(H, LANE), LANE)
    w1p = jnp.zeros((F, Hp), jnp.float32).at[:, :H].set(w1.astype(jnp.float32))
    b1p = jnp.zeros((1, Hp), jnp.float32).at[:, :H].set(
        jnp.reshape(b1, (1, H)).astype(jnp.float32))
    w2p = jnp.zeros((Hp, C), jnp.float32).at[:H, :].set(w2.astype(jnp.float32))
    b2p = jnp.reshape(b2, (1, C)).astype(jnp.float32)
    return w1p, b1p, w2p, b2p


def _pick_tile_b(batch, feat, h_pad, n_out, tile_b_request,
                 vmem_budget_bytes=12 << 20):
    """Largest multiple-of-8 batch tile that (a) fits a conservative VMEM budget
    (safe under v5e's 16 MiB scoped default and v6e/v7x's 32 MiB) and (b) leaves
    the grid with >= 2 steps whenever B > 8 so both v7x TensorCores get work."""
    tile_b = min(tile_b_request, _round_up(batch, 8))
    if batch > 8:
        tile_b = min(tile_b, _round_up(-(-batch // 2), 8))  # guarantee >= 2 steps
    tile_b = max(8, _round_up(tile_b, 8))

    def footprint(tb):
        x_io = 2 * tb * feat * 4                  # double-buffered input tile
        out_io = 2 * tb * n_out * 4               # double-buffered output tile
        # Resident operands, counted double-buffered (conservative).
        wts = 2 * (feat * h_pad + h_pad * n_out + h_pad + n_out) * 4
        live = tb * (h_pad + n_out) * 4           # h + logits live in the body
        return x_io + out_io + wts + live

    while tile_b > 8 and footprint(tile_b) > vmem_budget_bytes:
        tile_b = max(8, _round_up(tile_b // 2, 8))
    # NOTE: for very large feature_dim the right fix is a K (feature) grid axis
    # with an f32 accumulator, not shrinking tile_b toward 8.
    return tile_b


@functools.partial(jax.jit, static_argnames=("tile_b",))
def mlp_classifier_forward(x, w1p, b1p, w2p, b2p, *, tile_b=2048):
    """Fused MLP head forward: ReLU(x @ w1 + b1) @ w2 + b2 -> f32 logits (B, C)."""
    B, F = x.shape
    Hp = w1p.shape[1]
    C = w2p.shape[1]

    tb = _pick_tile_b(B, F, Hp, C, tile_b)
    grid = (pl.cdiv(B, tb),)  # ragged final block is masked by Pallas; no x copy

    return pl.pallas_call(
        _mlp_kernel,
        out_shape=jax.ShapeDtypeStruct((B, C), jnp.float32),
        grid_spec=pltpu.PrefetchScalarGridSpec(
            num_scalar_prefetch=0,
            grid=grid,
            in_specs=[
                pl.BlockSpec((tb, F), lambda i: (i, 0)),    # x tile (streams)
                pl.BlockSpec((F, Hp), lambda i: (0, 0)),    # w1 (resident)
                pl.BlockSpec((1, Hp), lambda i: (0, 0)),    # b1
                pl.BlockSpec((Hp, C), lambda i: (0, 0)),    # w2 (resident)
                pl.BlockSpec((1, C), lambda i: (0, 0)),     # b2
            ],
            out_specs=pl.BlockSpec((tb, C), lambda i: (i, 0)),
        ),
        compiler_params=pltpu.CompilerParams(
            dimension_semantics=("parallel",),   # batch axis shards across TCs (v7x)
            vmem_limit_bytes=32 << 20,           # explicit, safe on v5e/v6e/v7x
        ),
    )(x, w1p, b1p, w2p, b2p)


def init_params(key, feature_dim, num_classes):
    """Deterministic init mimicking PyTorch nn.Linear (uniform +/- 1/sqrt(fan_in));
    weights stored as (in, out) == transpose of torch's (out, in)."""
    k1, k2, k3, k4 = jax.random.split(key, 4)
    bound1 = 1.0 / jnp.sqrt(jnp.float32(feature_dim))
    bound2 = 1.0 / jnp.sqrt(jnp.float32(HIDDEN))
    w1 = jax.random.uniform(k1, (feature_dim, HIDDEN), jnp.float32, -bound1, bound1)
    b1 = jax.random.uniform(k2, (1, HIDDEN), jnp.float32, -bound1, bound1)
    w2 = jax.random.uniform(k3, (HIDDEN, num_classes), jnp.float32, -bound2, bound2)
    b2 = jax.random.uniform(k4, (1, num_classes), jnp.float32, -bound2, bound2)
    return w1, b1, w2, b2


if __name__ == "__main__":
    feature_dim = 32
    num_classes = 10

    key = jax.random.PRNGKey(0)
    kx, kp, kx2 = jax.random.split(key, 3)
    w1, b1, w2, b2 = init_params(kp, feature_dim, num_classes)
    params = prepare_params(w1, b1, w2, b2)   # one-time prep, reused across calls

    def ref_fn(xx):
        return jnp.maximum(xx @ w1 + b1, 0.0) @ w2 + b2

    # --- small batch: 2 grid steps of 8 rows (both v7x TensorCores get work) ---
    batch = 16
    x = jax.random.normal(kx, (batch, feature_dim), jnp.float32)
    logits = jax.block_until_ready(mlp_classifier_forward(x, *params))
    assert logits.shape == (batch, num_classes)
    assert jnp.allclose(logits, ref_fn(x), atol=1e-4, rtol=1e-4)

    # --- larger, non-tile-multiple batch: ragged last block, no x pad/copy ---
    batch2 = 1000
    x2 = jax.random.normal(kx2, (batch2, feature_dim), jnp.float32)
    logits2 = jax.block_until_ready(mlp_classifier_forward(x2, *params))
    assert logits2.shape == (batch2, num_classes)
    assert jnp.allclose(logits2, ref_fn(x2), atol=1e-4, rtol=1e-4)

    print("KERNEL_OK")
</pallas_src>

<mosaic_0001>
module attributes {stable_mosaic.version = 11 : i64} {
  func.func @_mlp_kernel(%arg0: i32, %arg1: memref<8x32xf32, #tpu.memory_space<vmem>>, %arg2: memref<32x128xf32, #tpu.memory_space<vmem>>, %arg3: memref<1x128xf32, #tpu.memory_space<vmem>>, %arg4: memref<128x10xf32, #tpu.memory_space<vmem>>, %arg5: memref<1x10xf32, #tpu.memory_space<vmem>>, %arg6: memref<8x10xf32, #tpu.memory_space<vmem>>) attributes {dimension_semantics = [#tpu.dimension_semantics<parallel>], iteration_bounds = array<i64: 2>, scalar_prefetch = 0 : i64, scratch_operands = 0 : i64, tpu.core_type = #tpu.core_type<tc>, window_params = [{transform_indices = @transform_0, window_bounds = array<i64: 8, 32>}, {pipeline_mode = #tpu.pipeline_mode<synchronous>, transform_indices = @transform_1, window_bounds = array<i64: 32, 128>}, {pipeline_mode = #tpu.pipeline_mode<synchronous>, transform_indices = @transform_2, window_bounds = array<i64: 1, 128>}, {pipeline_mode = #tpu.pipeline_mode<synchronous>, transform_indices = @transform_3, window_bounds = array<i64: 128, 10>}, {pipeline_mode = #tpu.pipeline_mode<synchronous>, transform_indices = @transform_4, window_bounds = array<i64: 1, 10>}, {transform_indices = @transform_5, window_bounds = array<i64: 8, 10>}]} {
    %c0 = arith.constant 0 : index
    %c0_0 = arith.constant 0 : index
    %0 = vector.load %arg1[%c0, %c0_0] : memref<8x32xf32, #tpu.memory_space<vmem>>, vector<8x32xf32>
    %c0_1 = arith.constant 0 : index
    %c0_2 = arith.constant 0 : index
    %1 = vector.load %arg2[%c0_1, %c0_2] : memref<32x128xf32, #tpu.memory_space<vmem>>, vector<32x128xf32>
    %cst = arith.constant dense<0.000000e+00> : vector<8x128xf32>
    %2 = tpu.matmul %0, %1, %cst {dimension_numbers = #tpu.dot_dimension_numbers<[1], [0], [0], [1], [0, 0, 1, 1], [], []>} : vector<8x32xf32>, vector<32x128xf32>, vector<8x128xf32> -> vector<8x128xf32>
    %c0_3 = arith.constant 0 : index
    %c0_4 = arith.constant 0 : index
    %3 = vector.load %arg3[%c0_3, %c0_4] : memref<1x128xf32, #tpu.memory_space<vmem>>, vector<1x128xf32>
    %4 = vector.broadcast %3 : vector<1x128xf32> to vector<8x128xf32>
    %5 = arith.addf %2, %4 : vector<8x128xf32>
    %cst_5 = arith.constant 0.000000e+00 : f32
    %6 = vector.broadcast %cst_5 : f32 to vector<8x128xf32>
    %7 = arith.maximumf %5, %6 : vector<8x128xf32>
    %c0_6 = arith.constant 0 : index
    %c0_7 = arith.constant 0 : index
    %8 = vector.load %arg4[%c0_6, %c0_7] : memref<128x10xf32, #tpu.memory_space<vmem>>, vector<128x10xf32>
    %cst_8 = arith.constant dense<0.000000e+00> : vector<8x10xf32>
    %9 = tpu.matmul %7, %8, %cst_8 {dimension_numbers = #tpu.dot_dimension_numbers<[1], [0], [0], [1], [0, 0, 1, 1], [], []>} : vector<8x128xf32>, vector<128x10xf32>, vector<8x10xf32> -> vector<8x10xf32>
    %c0_9 = arith.constant 0 : index
    %c0_10 = arith.constant 0 : index
    %10 = vector.load %arg5[%c0_9, %c0_10] : memref<1x10xf32, #tpu.memory_space<vmem>>, vector<1x10xf32>
    %11 = vector.broadcast %10 : vector<1x10xf32> to vector<8x10xf32>
    %12 = arith.addf %9, %11 : vector<8x10xf32>
    %c0_11 = arith.constant 0 : index
    %c0_12 = arith.constant 0 : index
    %13 = vector.load %arg6[%c0_11, %c0_12] : memref<8x10xf32, #tpu.memory_space<vmem>>, vector<8x10xf32>
    tpu.vector_store %arg6[%c0_11, %c0_12], %12 {strides = array<i32>} : memref<8x10xf32, #tpu.memory_space<vmem>>, vector<8x10xf32>,
    return
  }
  func.func @transform_0(%arg0: i32) -> (i32, i32) {
    %c0_i32 = arith.constant 0 : i32
    %c0_i32_0 = arith.constant 0 : i32
    return %arg0, %c0_i32 : i32, i32
  }
  func.func @transform_1(%arg0: i32) -> (i32, i32) {
    %c0_i32 = arith.constant 0 : i32
    %c0_i32_0 = arith.constant 0 : i32
    %c0_i32_1 = arith.constant 0 : i32
    return %c0_i32, %c0_i32_0 : i32, i32
  }
  func.func @transform_2(%arg0: i32) -> (i32, i32) {
    %c0_i32 = arith.constant 0 : i32
    %c0_i32_0 = arith.constant 0 : i32
    %c0_i32_1 = arith.constant 0 : i32
    return %c0_i32, %c0_i32_0 : i32, i32
  }
  func.func @transform_3(%arg0: i32) -> (i32, i32) {
    %c0_i32 = arith.constant 0 : i32
    %c0_i32_0 = arith.constant 0 : i32
    %c0_i32_1 = arith.constant 0 : i32
    return %c0_i32, %c0_i32_0 : i32, i32
  }
  func.func @transform_4(%arg0: i32) -> (i32, i32) {
    %c0_i32 = arith.constant 0 : i32
    %c0_i32_0 = arith.constant 0 : i32
    %c0_i32_1 = arith.constant 0 : i32
    return %c0_i32, %c0_i32_0 : i32, i32
  }
  func.func @transform_5(%arg0: i32) -> (i32, i32) {
    %c0_i32 = arith.constant 0 : i32
    %c0_i32_0 = arith.constant 0 : i32
    return %arg0, %c0_i32 : i32, i32
  }
}

</mosaic_0001>

<bundles_post_ra>
// kernel: mlp_classifier_forward.1
= control target key start
LH: loop header
LB: loop body
LE: loop exit
PB: predicated region body
PF: predicated region fallthrough
CT: control target
= control target key end

     0   :  { %10 = vsyncpa [#allocation3], 0  ;;  %s668_s0 = inlined_call_operand.vmem [shape: f32[16,32], index: 0, kind: input, shape index: {}]   ;;  %s669_s1 = inlined_call_operand.vmem [shape: f32[32,128], index: 1, kind: input, shape index: {}]   ;;  %s670_s2 = inlined_call_operand.vmem [shape: f32[1,128], index: 2, kind: input, shape index: {}]   ;;  %s671_s3 = inlined_call_operand.vmem [shape: f32[128,10], index: 3, kind: input, shape index: {}]   ;;  %s672_s4 = inlined_call_operand.vmem [shape: f32[1,10], index: 4, kind: input, shape index: {}]   ;;  %s673_s5 = inlined_call_operand.hbm [shape: f32[16,10], index: 5, kind: output, shape index: {}]  }
   0x1   :  { %12 = vsyncpa [#allocation3 + $0x1], 0  ;;  %s517_s18 = smov 0   ;;  %s519_s19 = smov 0  }
   0x2   :  { %s521_s20 = smov 0   ;;  %s523_s21 = smov 0  }
   0x3 LB: > { %s538_s22 = sadd.s32 4294967295, %s485_s21   ;;  %s371_s23 = sadd.s32 4294967294, %s485_s21   ;;  %s485_s21 = sphi %s523_s21, %s679_s21   ;;  %s481_s20 = sphi %s521_s20, %s678_s20   ;;  %s477_s19 = sphi %s519_s19, %s677_s19   ;;  %s473_s18 = sphi %s517_s18, %s676_s18  }
   0x4   : > { %s542_s24 = sadd.s32 1, %s485_s21   ;;  %s135_s25 = sadd.s32 1, %s481_s20 }
   0x5   : > { %s132_s26 = ssub.s32 %s485_s21, %s542_s24  ;;  %p145_p0 = scmp.ne.s32.totalorder %s481_s20, %s477_s19 }
   0x6   : > { %p133_p1 = scmp.eq.s32.totalorder %s132_s26, 0  ;;  %p146_p2 = scmp.eq.s32.totalorder %s538_s22, 1 }
   0x7   : > { %p151_p3 = scmp.ne.s32.totalorder %s477_s19, %s473_s18  ;;  %p152_p4 = scmp.eq.s32.totalorder %s371_s23, 1 }
   0x8   : > { %s553_s27 = scalar_select %p133_p1, %s481_s20, %s135_s25  }
   0x9   : > { %p555_p5 = por %p146_p2, %p145_p0  ;;  %p559_p6 = por %p152_p4, %p151_p3 }
   0xa   : > { %p374_p7 = scmp.ge.s32.totalorder %s485_s21, 1  ;;  %p189_p8 = scmp.lt.s32.totalorder %s485_s21, 3 }
   0xc   : > { %p190_p9 = pnand %p374_p7, %p189_p8 }
   0xd   : > { %p216_p10 = scmp.lt.s32.totalorder (!%p190_p9), %s538_s22, 1  ;;  %s379_s6 = sshll.u32 (!%p190_p9), %s538_s22, 3 }
   0xe   : > { %193 = sbr.rel (%p190_p9) target bundleno = 288 (0x120), region = 40  ;;  %s307_s9 = scalar_lea.hbm (!%p190_p9), %s673_s5, %s379_s6 }
   0xf   : > { %s311_s14 = sshll.u32 (!%p190_p9), %s307_s9, 4  ;;  %s443_s25 = scalar_lea.hbm (!%p190_p9), %s673_s5, 16  ;;  %s312_s14 = int_to_ptr.hbm [resolvable:$true] %s311_s14 }
  0x13   : > { %v224_v0 = vld [vmem:[%s669_s1 + $0x18] sm:$0xff]  ;;  %v223_v1 = vld [vmem:[%s669_s1 + $0x10] sm:$0xff]  ;;  %v222_v4 = vld [vmem:[%s669_s1 + $0x8] sm:$0xff]  ;;  %s217_s15 = scalar_select %p216_p10, %s538_s22, 1  ;;  %vm229_vm0 = vcmask 261120   ;;  %vm294_vm1 = vcmask 80896  }
  0x14   : > { %245 = vmatpush.msra.mxu0 %v224_v0  ;;  %v269_v2 = vld [vmem:[%s671_s3 + $0x78] sm:$0xff]  ;;  %v268_v3 = vld [vmem:[%s671_s3 + $0x70] sm:$0xff]  ;;  %v267_v5 = vld [vmem:[%s671_s3 + $0x68] sm:$0xff]  ;;  %s437_s22 = sshra.s32 %s312_s14, 4  ;;  %s438_s22 = int_to_ptr.hbm [resolvable:$true] %s437_s22 }
  0x15   : > { %274 = vmatpush.msra.mxu1 %v269_v2  ;;  %v221_v6 = vld [vmem:[%s669_s1] sm:$0xff]  ;;  %s376_s26 = sshll.u32 %s217_s15, 3  ;;  %v265_v9 = vld [vmem:[%s671_s3 + $0x58] sm:$0xff]  ;;  %v264_v10 = vld [vmem:[%s671_s3 + $0x50] sm:$0xff]  ;;  %s439_s16 = scalar_lea.hbm %s438_s22, 8 }
  0x16   : > { %246 = vmatpush.msra.mxu0 %v223_v1  ;;  %s219_s7 = scalar_lea.vmem %s668_s0, %s376_s26  ;;  %v266_v7 = vld [vmem:[%s671_s3 + $0x60] sm:$0xff]  ;;  %v263_v11 = vld [vmem:[%s671_s3 + $0x48] sm:$0xff]  ;;  %v261_v13 = vld [vmem:[%s671_s3 + $0x38] sm:$0xff]  ;;  %s213_s26 = sand.u32 1, %s477_s19  }
  0x17   : > { %275 = vmatpush.msra.mxu1 %v268_v3  ;;  %v220_v8 = vld [vmem:[%s219_s7] sm:$0xff]  ;;  %v260_v14 = vld [vmem:[%s671_s3 + $0x30] sm:$0xff]  ;;  %v259_v15 = vld [vmem:[%s671_s3 + $0x28] sm:$0xff]  ;;  %s375_s30 = sshll.u32 %s213_s26, 3  ;;  %s297_s15 = scalar_lea.sflag [#allocation3], %s213_s26 }
  0x18   : > { %247 = vmatpush.msra.mxu0 %v222_v4  ;;  %v262_v12 = vld [vmem:[%s671_s3 + $0x40] sm:$0xff]  ;;  %v257_v17 = vld [vmem:[%s671_s3 + $0x18] sm:$0xff]  ;;  %v256_v18 = vld [vmem:[%s671_s3 + $0x10] sm:$0xff]  ;;  %s215_s12 = scalar_lea.vmem [#allocation2], %s375_s30  ;;  %p440_p11 = scmp.ne.s32.totalorder %s438_s22, %s439_s16 }
  0x19   : > { %276 = vmatpush.msra.mxu1 %v267_v5  ;;  %v258_v16 = vld [vmem:[%s671_s3 + $0x20] sm:$0xff]  ;;  %v255_v19 = vld [vmem:[%s671_s3 + $0x8] sm:$0xff]  ;;  %s309_s13 = sshll.u32 %s215_s12, 4  ;;  %p444_p0 = scmp.lt.s32.totalorder %s438_s22, %s673_s5  ;;  %s310_s13 = int_to_ptr.vmem [resolvable:$true] %s309_s13 }
  0x1a   : > { %248 = vmatpush.msra.mxu0 %v221_v6  ;;  %v254_v20 = vld [vmem:[%s671_s3] sm:$0xff]  ;;  %p441_p12 = pnand %p440_p11, %p555_p5  ;;  %p445_p1 = scmp.lt.s32.totalorder %s443_s25, %s439_s16 }
  0x1b   : > { %377 = vmatmul.msk.f32.vlgmr.msra.gmra.mxu0 %vm229_vm0, %v220_v8  ;;  %277 = vmatpush.msra.mxu1 %v266_v7  ;;  %v421_v21 = vld [vmem:[%s670_s2] ss:$0 sm:$0xff] }
  0x1c   : > { %v422_v25 = vld [vmem:[%s672_s4] ss:$0 sm:$0xff]  ;;  %p442_p13 = pneg %p441_p12  ;;  %p446_p2 = por %p445_p1, %p444_p0 }
  0x1d   : > { %278 = vmatpush.msra.mxu1 %v265_v9 }
  0x1e   : > { %p447_p3 = pnand %p446_p2, %p442_p13 }
  0x1f   : > { %279 = vmatpush.msra.mxu1 %v264_v10 }
  0x21   : > { %280 = vmatpush.msra.mxu1 %v263_v11 }
  0x23   : > { %281 = vmatpush.msra.mxu1 %v262_v12 }
  0x25   : > { %282 = vmatpush.msra.mxu1 %v261_v13 }
  0x27   : > { %283 = vmatpush.msra.mxu1 %v260_v14 }
  0x29   : > { %284 = vmatpush.msra.mxu1 %v259_v15 }
  0x2b   : > { %285 = vmatpush.msra.mxu1 %v258_v16 }
  0x2d   : > { %286 = vmatpush.msra.mxu1 %v257_v17 }
  0x2f   : > { %287 = vmatpush.msra.mxu1 %v256_v18 }
  0x31   : > { %288 = vmatpush.msra.mxu1 %v255_v19 }
  0x33   : > { %289 = vmatpush.msra.mxu1 %v254_v20 }
  0x98   : > { %v250_v22 = vpop.f32.mrf.mxu0 }
  0x99   : > { %v251_v23 = vadd.f32 %v421_v21, %v250_v22 }
  0x9b   : > { %v253_v24 = vmax.f32 %v251_v23, 0.0 }
  0x9d   : > { %290 = vmatmul.f32.vlgmr.msra.gmra.mxu1 %v253_v24 }
 0x11a   : > { %v291_v26 = vpop.f32.mrf.mxu1 }
 0x11b   : > { %v292_v27 = vadd.f32 %v422_v25, %v291_v26 }
 0x11d   : > { %295 = vst.msk [vmem:[%s215_s12] sm:$0xff] %vm294_vm1, %v292_v27 }
 0x11e   : > { %450 = shalt.err (!%p447_p3)
}
 0x11f   : > { %382 = dma.vmem_to_hbm [thread:$0]  (%p555_p5), %s310_s13, 128, %s312_s14, %s297_s15  }
 0x120 PF: > { %p388_p4 = scmp.ge.s32.totalorder %s485_s21, 2  ;;  %s323_s26 = sand.u32 1, %s473_s18  }
 0x121   : > { %s324_s7 = scalar_lea.sflag [#allocation3], %s323_s26 }
 0x122   : > { %p385_p7 = pnand %p388_p4, %p559_p6 }
 0x124   : > { %p386_p8 = pneg %p385_p7 }
 0x126   : > { %468 = dma.done.wait (%p386_p8), %s324_s7, 128  }
 0x127   : > { %470 = vsyncadd (%p386_p8), %s324_s7, 4294967168  ;;  %p15_p9 = scmp.ge.s32.totalorder %s542_s24, 4   ;;  %s676_s18 = smov %s477_s19 }
 0x128   : > { %s677_s19 = smov %s481_s20  ;;  %s678_s20 = smov %s553_s27 }
 0x129   : > { %s679_s21 = smov %s542_s24  ;;  %17 = sbr.rel (!%p15_p9) target bundleno = 3 (0x3), region = 75 }
 0x12e   :  { %330 = vsyncpa [#allocation3], 1 }
 0x12f   :  { %332 = vsyncpa [#allocation3 + $0x1], 1 }

</bundles_post_ra>
